<compile_context>
chip_gen: v5e
topology: v5e:2x2
jax: 0.10.0
libtpu: 0.0.40
codegen_flags: <defaults>
</compile_context>

<pallas_src>
import jax
import jax.numpy as jnp
from jax import lax
from jax.experimental import pallas as pl
from jax.experimental.pallas import tpu as pltpu


# ---------------------------------------------------------------------------
# Kernel
# ---------------------------------------------------------------------------
def _make_invres_kernel(H, W, stride, has_expand, use_res, th, n_ht):
    """Build a kernel specialized on the static block configuration."""
    HW = H * W
    if stride == 1:
        PAD = W + 1
        L = HW + 2 * PAD
    else:
        Hq, Wq = H // 2, W // 2
        QS = Hq * Wq                       # output positions = quadrant size
        PAD = Wq + 1
        SEG = PAD + QS
        L = 4 * SEG

    def kernel(*refs):
        it = iter(refs)
        x_ref = next(it)                   # (1, C_in, HW)   f32
        if has_expand:
            we_ref = next(it)              # (th, C_in)      bf16 (BN folded)
            b1_ref = next(it)              # (th, 1)         f32
        wdw_ref = next(it)                 # (th, 9)         f32  (BN folded)
        b2_ref = next(it)                  # (th, 1)         f32
        wp_ref = next(it)                  # (C_out, th)     bf16 (BN folded)
        b3_ref = next(it)                  # (C_out, 1)      f32
        cm_ref = next(it)                  # (2, HW) / (1, QS) column masks
        o_ref = next(it)                   # (1, C_out, HWo) f32
        hp_ref = next(it)                  # (th, L)         f32 VMEM scratch

        ht = pl.program_id(1)              # hidden-tile index (reduction axis)

        x = x_ref[0]                       # (C_in, HW), spatial on lanes

        # ---- 1) expand 1x1 (+ folded BN1) + ReLU6  (bf16 MXU, f32 acc) -----
        if has_expand:
            h = jnp.dot(we_ref[...], x.astype(jnp.bfloat16),
                        preferred_element_type=jnp.float32)
            h = jnp.clip(h + b1_ref[...], 0.0, 6.0)
        else:
            h = x                          # expand_ratio == 1

        # ---- 2) depthwise 3x3 (+ folded BN2) + ReLU6  (f32 VPU) ------------
        # Zero only the pad strips, once per image (first hidden tile); the
        # scratch persists across grid steps and the interior is fully
        # overwritten below.  Gating on ht==0 (not the batch axis) stays
        # correct if the "parallel" batch axis is sharded across TensorCores.
        @pl.when(ht == 0)
        def _zero_pads():
            if stride == 1:
                hp_ref[:, 0:PAD] = jnp.zeros((th, PAD), jnp.float32)
                hp_ref[:, PAD + HW:PAD + HW + PAD] = jnp.zeros(
                    (th, PAD), jnp.float32)
            else:
                for q in range(4):
                    hp_ref[:, q * SEG:q * SEG + PAD] = jnp.zeros(
                        (th, PAD), jnp.float32)

        def wk(k):                         # per-tap depthwise weight (th, 1)
            return wdw_ref[:, k:k + 1]

        if stride == 1:
            hp_ref[:, PAD:PAD + HW] = h
            left = cm_ref[0:1, :]          # 1.0 where col >= 1
            right = cm_ref[1:2, :]         # 1.0 where col <= W-2
            # accumulator bias-initialized with the folded BN shift
            acc = jnp.broadcast_to(b2_ref[...], (th, HW))
            for kj in range(3):
                part = None
                for ki in range(3):
                    t = wk(ki * 3 + kj) * hp_ref[:, ki * W + kj:
                                                 ki * W + kj + HW]
                    part = t if part is None else part + t
                if kj == 0:
                    part = part * left     # one mask multiply per kj group
                elif kj == 2:
                    part = part * right
                acc = acc + part
        else:
            # h columns are quadrant-permuted: [EE | EO | OE | OO], each a
            # row-major (Hq, Wq) block (E/O = even/odd input row / column).
            # Output (io, jo) only needs each quadrant shifted by (0/-1, 0/-1),
            # so stride-2 decimation is free: no selection matmul, no
            # lane-strided access, and the EE ordering is already the
            # row-major output ordering.
            for q in range(4):
                hp_ref[:, q * SEG + PAD:q * SEG + PAD + QS] = \
                    h[:, q * QS:(q + 1) * QS]
            left = cm_ref[0:1, :]          # 1.0 where output col jo >= 1

            def tap(q, dr, dc):
                s = q * SEG + PAD + dr * Wq + dc
                return hp_ref[:, s:s + QS]

            acc = jnp.broadcast_to(b2_ref[...], (th, QS))
            # dc == 0 taps: no mask needed (row OOB lands in the zero pads)
            acc = acc + wk(4) * tap(0, 0, 0)                      # (ki,kj)=(1,1)
            acc = acc + wk(5) * tap(1, 0, 0)                      # (1,2)
            acc = acc + wk(1) * tap(2, -1, 0) + wk(7) * tap(2, 0, 0)  # (0,1),(2,1)
            acc = acc + wk(2) * tap(3, -1, 0) + wk(8) * tap(3, 0, 0)  # (0,2),(2,2)
            # dc == -1 taps share a single left-column mask multiply
            lpart = (wk(3) * tap(1, 0, -1)                        # (1,0)
                     + wk(0) * tap(3, -1, -1)                     # (0,0)
                     + wk(6) * tap(3, 0, -1))                     # (2,0)
            acc = acc + lpart * left

        dw = jnp.clip(acc, 0.0, 6.0)       # (th, HWo)

        # ---- 3) project 1x1 (+ folded BN3), bf16 MXU, accumulate over ht ----
        part_out = jnp.dot(wp_ref[...], dw.astype(jnp.bfloat16),
                           preferred_element_type=jnp.float32)  # (C_out, HWo)

        if n_ht == 1:
            out = part_out + b3_ref[...]
            if use_res:
                out = out + x
            o_ref[0] = out
        else:
            @pl.when(ht == 0)
            def _init():
                out = part_out + b3_ref[...]
                if use_res:
                    out = out + x
                o_ref[0] = out

            @pl.when(ht > 0)
            def _accum():
                o_ref[0] = o_ref[0] + part_out

    return kernel


# ---------------------------------------------------------------------------
# Wrapper
# ---------------------------------------------------------------------------
def _fold_bn(w, gamma, beta, mean, var, eps):
    """Fold eval-mode BN into the preceding conv weight; return (w*scale, shift)."""
    scale = gamma / jnp.sqrt(var + eps)
    w_s = (w * scale.reshape((-1,) + (1,) * (w.ndim - 1))).astype(jnp.float32)
    shift = (beta - mean * scale).reshape(-1, 1).astype(jnp.float32)
    return w_s, shift


def _pad_rows(a, n_rows):
    if a.shape[0] == n_rows:
        return a
    pad = jnp.zeros((n_rows - a.shape[0],) + a.shape[1:], a.dtype)
    return jnp.concatenate([a, pad], axis=0)


def _pad_cols(a, n_cols):
    if a.shape[1] == n_cols:
        return a
    pad = jnp.zeros((a.shape[0], n_cols - a.shape[1]), a.dtype)
    return jnp.concatenate([a, pad], axis=1)


def invres_block(x, params, *, stride, expand_ratio, eps=1e-5,
                 max_hidden_tile=256):
    """InvResBlock forward (eval-mode BN), fused in one pallas_call.

    x:      (N, C_in, H, W) float32, NCHW (PyTorch layout)
    params: dict with
        'we'  : (hidden, C_in, 1, 1)  and 'bn1' (only if expand_ratio != 1)
        'wdw' : (hidden, 1, 3, 3), 'bn2'
        'wp'  : (C_out, hidden, 1, 1), 'bn3'
      where each 'bn*' is (gamma, beta, running_mean, running_var).
    """
    assert stride in (1, 2)
    N, C_in, H, W = x.shape
    assert W >= 2, "kernel assumes W >= 2"
    HW = H * W
    hidden = int(round(C_in * expand_ratio))
    has_expand = expand_ratio != 1
    C_out = params["wp"].shape[0]
    use_res = (stride == 1) and (C_in == C_out)

    if stride == 2:
        # TODO(synk): odd H/W stride-2 needs masking of padded quadrant cols.
        assert H % 2 == 0 and W % 2 == 0, "stride-2 path requires even H, W"
        H_out, W_out = H // 2, W // 2
    else:
        H_out, W_out = H, W
    HWo = H_out * W_out

    # Hidden-channel tiling so the expanded activation tile fits VMEM at real
    # MobileNet spatial sizes; project conv accumulates across tiles.
    if has_expand and hidden > max_hidden_tile:
        assert max_hidden_tile % 128 == 0
        th = max_hidden_tile
        n_ht = -(-hidden // th)
        hidden_p = n_ht * th
    else:
        th, n_ht, hidden_p = hidden, 1, hidden

    # Fold eval-mode BN into weights; pad hidden dim to the tiled size with
    # zeros (padded channels contribute nothing through the zero wp columns).
    wdw_s, b2 = _fold_bn(params["wdw"][:, 0].reshape(hidden, 9),
                         *params["bn2"], eps)
    wp_s, b3 = _fold_bn(params["wp"][:, :, 0, 0], *params["bn3"], eps)
    wdw_s, b2 = _pad_rows(wdw_s, hidden_p), _pad_rows(b2, hidden_p)
    wp_s = _pad_cols(wp_s, hidden_p).astype(jnp.bfloat16)

    # Pure reshape (no transpose): spatial goes on lanes.
    x3 = x.reshape(N, C_in, HW).astype(jnp.float32)
    if stride == 1:
        col = jnp.arange(HW, dtype=jnp.int32) % W
        cmask = jnp.stack([(col >= 1), (col <= W - 2)],
                          axis=0).astype(jnp.float32)
    else:
        Hq, Wq = H_out, W_out
        ii = jnp.arange(Hq, dtype=jnp.int32)
        jj = jnp.arange(Wq, dtype=jnp.int32)

        def quad(ro, co):
            return ((2 * ii[:, None] + ro) * W
                    + (2 * jj[None, :] + co)).reshape(-1)

        # quadrant-permuted spatial order: [EE | EO | OE | OO]
        perm = jnp.concatenate([quad(0, 0), quad(0, 1), quad(1, 0), quad(1, 1)])
        x3 = jnp.take(x3, perm, axis=2)
        jo = jnp.arange(HWo, dtype=jnp.int32) % Wq
        cmask = (jo >= 1).astype(jnp.float32).reshape(1, HWo)

    operands = [x3]
    in_specs = [pl.BlockSpec((1, C_in, HW), lambda n, t: (n, 0, 0))]
    if has_expand:
        we_s, b1 = _fold_bn(params["we"][:, :, 0, 0], *params["bn1"], eps)
        we_s = _pad_rows(we_s, hidden_p).astype(jnp.bfloat16)
        b1 = _pad_rows(b1, hidden_p)
        operands += [we_s, b1]
        in_specs += [pl.BlockSpec((th, C_in), lambda n, t: (t, 0)),
                     pl.BlockSpec((th, 1), lambda n, t: (t, 0))]

    operands += [wdw_s, b2, wp_s, b3, cmask]
    in_specs += [
        pl.BlockSpec((th, 9), lambda n, t: (t, 0)),
        pl.BlockSpec((th, 1), lambda n, t: (t, 0)),
        pl.BlockSpec((C_out, th), lambda n, t: (0, t)),
        pl.BlockSpec((C_out, 1), lambda n, t: (0, 0)),
        pl.BlockSpec(cmask.shape, lambda n, t: (0, 0)),
    ]

    scratch_len = (HW + 2 * (W + 1)) if stride == 1 else 4 * (HWo + W_out + 1)

    kernel = _make_invres_kernel(H, W, stride, has_expand, use_res, th, n_ht)

    # Explicit VMEM budget: double-buffered blocks + scratch + intermediates.
    blk_elems = (C_in * HW + th * C_in + th * 9 + 2 * th + C_out * th
                 + C_out + int(cmask.size) + C_out * HWo)
    est = 4 * (2 * blk_elems + th * scratch_len + 6 * th * HW) + (2 << 20)
    try:
        phys_vmem = int(pltpu.get_tpu_info().vmem_capacity_bytes)
    except Exception:
        phys_vmem = 64 * 2 ** 20           # conservative (v7x) fallback
    vmem_limit = int(min(int(phys_vmem * 0.9), max(32 * 2 ** 20, est)))

    flops = ((2 * N * hidden_p * C_in * HW if has_expand else 0)
             + 2 * 9 * N * hidden_p * HWo
             + 2 * N * C_out * hidden_p * HWo)
    bytes_accessed = int(sum(int(o.size) * o.dtype.itemsize for o in operands)
                         + 4 * N * C_out * HWo)

    out3 = pl.pallas_call(
        kernel,
        out_shape=jax.ShapeDtypeStruct((N, C_out, HWo), jnp.float32),
        grid_spec=pltpu.PrefetchScalarGridSpec(
            num_scalar_prefetch=0,
            grid=(N, n_ht),                # batch parallel, hidden-tile reduce
            in_specs=in_specs,
            out_specs=pl.BlockSpec((1, C_out, HWo), lambda n, t: (n, 0, 0)),
            scratch_shapes=[pltpu.VMEM((th, scratch_len), jnp.float32)],
        ),
        compiler_params=pltpu.CompilerParams(
            dimension_semantics=("parallel", "arbitrary"),
            vmem_limit_bytes=vmem_limit),
        cost_estimate=pl.CostEstimate(
            flops=int(flops), transcendentals=0,
            bytes_accessed=bytes_accessed),
    )(*operands)

    return out3.reshape(N, C_out, H_out, W_out)


# ---------------------------------------------------------------------------
# Pure-JAX reference (for correctness check)
# ---------------------------------------------------------------------------
def invres_ref(x, params, *, stride, expand_ratio, eps=1e-5):
    C_in = x.shape[1]
    C_out = params["wp"].shape[0]
    dn = ("NCHW", "OIHW", "NCHW")

    def bn(y, p):
        gamma, beta, mean, var = p
        s = gamma / jnp.sqrt(var + eps)
        return (y * s[None, :, None, None]
                + (beta - mean * s)[None, :, None, None])

    h = x
    if expand_ratio != 1:
        h = lax.conv_general_dilated(h, params["we"], (1, 1), [(0, 0), (0, 0)],
                                     dimension_numbers=dn,
                                     precision=lax.Precision.HIGHEST)
        h = jnp.clip(bn(h, params["bn1"]), 0.0, 6.0)
    hidden = h.shape[1]
    h = lax.conv_general_dilated(h, params["wdw"], (stride, stride),
                                 [(1, 1), (1, 1)], dimension_numbers=dn,
                                 feature_group_count=hidden,
                                 precision=lax.Precision.HIGHEST)
    h = jnp.clip(bn(h, params["bn2"]), 0.0, 6.0)
    h = lax.conv_general_dilated(h, params["wp"], (1, 1), [(0, 0), (0, 0)],
                                 dimension_numbers=dn,
                                 precision=lax.Precision.HIGHEST)
    h = bn(h, params["bn3"])
    if stride == 1 and C_in == C_out:
        h = x + h
    return h


def _make_params(key, C_in, C_out, expand_ratio):
    hidden = int(round(C_in * expand_ratio))
    ks = jax.random.split(key, 6)

    def bn_params(k, c):
        k1, k2, k3, k4 = jax.random.split(k, 4)
        gamma = 1.0 + 0.1 * jax.random.normal(k1, (c,), jnp.float32)
        beta = 0.1 * jax.random.normal(k2, (c,), jnp.float32)
        mean = 0.1 * jax.random.normal(k3, (c,), jnp.float32)
        var = jnp.abs(1.0 + 0.1 * jax.random.normal(k4, (c,), jnp.float32))
        return (gamma, beta, mean, var)

    params = {}
    if expand_ratio != 1:
        params["we"] = 0.3 * jax.random.normal(
            ks[0], (hidden, C_in, 1, 1), jnp.float32)
        params["bn1"] = bn_params(ks[1], hidden)
    params["wdw"] = 0.3 * jax.random.normal(
        ks[2], (hidden, 1, 3, 3), jnp.float32)
    params["bn2"] = bn_params(ks[3], hidden)
    params["wp"] = 0.3 * jax.random.normal(
        ks[4], (C_out, hidden, 1, 1), jnp.float32)
    params["bn3"] = bn_params(ks[5], C_out)
    return params


if __name__ == "__main__":
    key = jax.random.PRNGKey(0)
    k_x1, k_x2, k1, k2, k3, k4, k5 = jax.random.split(key, 7)

    N, H, W = 2, 16, 16
    x_small = jax.random.normal(k_x1, (N, 4, H, W), dtype=jnp.float32)
    x_big = jax.random.normal(k_x2, (N, 32, H, W), dtype=jnp.float32)

    configs = [
        # (x, C_out, stride, expand_ratio, max_hidden_tile, key)
        (x_small, 4, 1, 6, 256, k1),   # expand + residual
        (x_small, 8, 2, 6, 256, k2),   # expand + stride-2 quadrant path
        (x_small, 4, 1, 1, 256, k3),   # expand_ratio == 1 (dw + project only)
        (x_big, 32, 1, 6, 128, k4),    # hidden=192 -> 2 hidden tiles + residual
        (x_big, 24, 2, 6, 128, k5),    # hidden tiles + stride-2
    ]

    for (xc, co, stride, er, mht, kp) in configs:
        ci = xc.shape[1]
        params = _make_params(kp, ci, co, er)
        out = jax.block_until_ready(
            invres_block(xc, params, stride=stride, expand_ratio=er,
                         max_hidden_tile=mht))
        ref = jax.block_until_ready(
            invres_ref(xc, params, stride=stride, expand_ratio=er))
        assert out.shape == ref.shape, (out.shape, ref.shape)
        err = jnp.abs(out - ref)
        max_err = float(jnp.max(err))
        rel_rms = float(jnp.sqrt(jnp.mean(err ** 2))
                        / (jnp.sqrt(jnp.mean(ref ** 2)) + 1e-6))
        # bf16 1x1-conv matmuls (f32 accumulate) vs f32 HIGHEST reference.
        assert rel_rms < 2e-2, (ci, co, stride, er, rel_rms)
        assert max_err < 0.1 * (1.0 + float(jnp.max(jnp.abs(ref)))), (
            ci, co, stride, er, max_err)

    print("KERNEL_OK")
</pallas_src>

<mosaic_0001>
module attributes {stable_mosaic.version = 11 : i64} {
  func.func @kernel(%arg0: i32, %arg1: i32, %arg2: memref<1x4x256xf32, #tpu.memory_space<vmem>>, %arg3: memref<24x4xbf16, #tpu.memory_space<vmem>>, %arg4: memref<24x1xf32, #tpu.memory_space<vmem>>, %arg5: memref<24x9xf32, #tpu.memory_space<vmem>>, %arg6: memref<24x1xf32, #tpu.memory_space<vmem>>, %arg7: memref<4x24xbf16, #tpu.memory_space<vmem>>, %arg8: memref<4x1xf32, #tpu.memory_space<vmem>>, %arg9: memref<2x256xf32, #tpu.memory_space<vmem>>, %arg10: memref<1x4x256xf32, #tpu.memory_space<vmem>>, %arg11: memref<24x290xf32, #tpu.memory_space<vmem>>) attributes {dimension_semantics = [#tpu.dimension_semantics<parallel>, #tpu.dimension_semantics<arbitrary>], iteration_bounds = array<i64: 2, 1>, scalar_prefetch = 0 : i64, scratch_operands = 1 : i64, tpu.core_type = #tpu.core_type<tc>, window_params = [{transform_indices = @transform_0, window_bounds = array<i64: 1, 4, 256>}, {transform_indices = @transform_1, window_bounds = array<i64: 24, 4>}, {transform_indices = @transform_2, window_bounds = array<i64: 24, 1>}, {transform_indices = @transform_3, window_bounds = array<i64: 24, 9>}, {transform_indices = @transform_4, window_bounds = array<i64: 24, 1>}, {transform_indices = @transform_5, window_bounds = array<i64: 4, 24>}, {pipeline_mode = #tpu.pipeline_mode<synchronous>, transform_indices = @transform_6, window_bounds = array<i64: 4, 1>}, {pipeline_mode = #tpu.pipeline_mode<synchronous>, transform_indices = @transform_7, window_bounds = array<i64: 2, 256>}, {transform_indices = @transform_8, window_bounds = array<i64: 1, 4, 256>}]} {
    %c0 = arith.constant 0 : index
    %c0_0 = arith.constant 0 : index
    %c0_1 = arith.constant 0 : index
    %0 = vector.load %arg2[%c0, %c0_0, %c0_1] : memref<1x4x256xf32, #tpu.memory_space<vmem>>, vector<1x4x256xf32>
    %1 = vector.shape_cast %0 : vector<1x4x256xf32> to vector<4x256xf32>
    %c0_2 = arith.constant 0 : index
    %c0_3 = arith.constant 0 : index
    %2 = vector.load %arg3[%c0_2, %c0_3] : memref<24x4xbf16, #tpu.memory_space<vmem>>, vector<24x4xbf16>
    %3 = arith.truncf %1 : vector<4x256xf32> to vector<4x256xbf16>
    %cst = arith.constant dense<0.000000e+00> : vector<24x256xf32>
    %4 = tpu.matmul %2, %3, %cst {dimension_numbers = #tpu.dot_dimension_numbers<[1], [0], [0], [1], [0, 0, 1, 1], [], []>} : vector<24x4xbf16>, vector<4x256xbf16>, vector<24x256xf32> -> vector<24x256xf32>
    %c0_4 = arith.constant 0 : index
    %c0_5 = arith.constant 0 : index
    %5 = vector.load %arg4[%c0_4, %c0_5] : memref<24x1xf32, #tpu.memory_space<vmem>>, vector<24x1xf32>
    %6 = vector.broadcast %5 : vector<24x1xf32> to vector<24x256xf32>
    %7 = arith.addf %4, %6 : vector<24x256xf32>
    %cst_6 = arith.constant 0.000000e+00 : f32
    %cst_7 = arith.constant 6.000000e+00 : f32
    %8 = vector.broadcast %cst_6 : f32 to vector<24x256xf32>
    %9 = arith.maximumf %8, %7 : vector<24x256xf32>
    %10 = vector.broadcast %cst_7 : f32 to vector<24x256xf32>
    %11 = arith.minimumf %10, %9 : vector<24x256xf32>
    %c0_i32 = arith.constant 0 : i32
    %12 = arith.cmpi eq, %arg1, %c0_i32 : i32
    %13 = arith.extui %12 : i1 to i32
    %c0_i32_8 = arith.constant 0 : i32
    %14 = arith.cmpi ne, %13, %c0_i32_8 : i32
    scf.if %14 {
      %cst_49 = arith.constant 0.000000e+00 : f32
      %84 = vector.broadcast %cst_49 : f32 to vector<24x17xf32>
      %c0_50 = arith.constant 0 : index
      %c0_51 = arith.constant 0 : index
      %85 = vector.load %arg11[%c0_50, %c0_51] : memref<24x290xf32, #tpu.memory_space<vmem>>, vector<24x17xf32>
      tpu.vector_store %arg11[%c0_50, %c0_51], %84 {strides = array<i32>} : memref<24x290xf32, #tpu.memory_space<vmem>>, vector<24x17xf32>,
      %cst_52 = arith.constant 0.000000e+00 : f32
      %86 = vector.broadcast %cst_52 : f32 to vector<24x17xf32>
      %c0_53 = arith.constant 0 : index
      %c273 = arith.constant 273 : index
      %87 = vector.load %arg11[%c0_53, %c273] : memref<24x290xf32, #tpu.memory_space<vmem>>, vector<24x17xf32>
      tpu.vector_store %arg11[%c0_53, %c273], %86 {strides = array<i32>} : memref<24x290xf32, #tpu.memory_space<vmem>>, vector<24x17xf32>,
    } else {
    }
    %c0_9 = arith.constant 0 : index
    %c17 = arith.constant 17 : index
    %15 = vector.load %arg11[%c0_9, %c17] : memref<24x290xf32, #tpu.memory_space<vmem>>, vector<24x256xf32>
    tpu.vector_store %arg11[%c0_9, %c17], %11 {strides = array<i32>} : memref<24x290xf32, #tpu.memory_space<vmem>>, vector<24x256xf32>,
    %c0_10 = arith.constant 0 : index
    %c0_11 = arith.constant 0 : index
    %16 = vector.load %arg9[%c0_10, %c0_11] : memref<2x256xf32, #tpu.memory_space<vmem>>, vector<1x256xf32>
    %c1 = arith.constant 1 : index
    %c0_12 = arith.constant 0 : index
    %17 = vector.load %arg9[%c1, %c0_12] : memref<2x256xf32, #tpu.memory_space<vmem>>, vector<1x256xf32>
    %c0_13 = arith.constant 0 : index
    %c0_14 = arith.constant 0 : index
    %18 = vector.load %arg6[%c0_13, %c0_14] : memref<24x1xf32, #tpu.memory_space<vmem>>, vector<24x1xf32>
    %19 = vector.shape_cast %18 : vector<24x1xf32> to vector<24x1xf32>
    %20 = vector.broadcast %19 : vector<24x1xf32> to vector<24x256xf32>
    %c0_15 = arith.constant 0 : index
    %c0_16 = arith.constant 0 : index
    %21 = vector.load %arg5[%c0_15, %c0_16] : memref<24x9xf32, #tpu.memory_space<vmem>>, vector<24x1xf32>
    %c0_17 = arith.constant 0 : index
    %c0_18 = arith.constant 0 : index
    %22 = vector.load %arg11[%c0_17, %c0_18] : memref<24x290xf32, #tpu.memory_space<vmem>>, vector<24x256xf32>
    %23 = vector.broadcast %21 : vector<24x1xf32> to vector<24x256xf32>
    %24 = arith.mulf %23, %22 : vector<24x256xf32>
    %c0_19 = arith.constant 0 : index
    %c3 = arith.constant 3 : index
    %25 = vector.load %arg5[%c0_19, %c3] : memref<24x9xf32, #tpu.memory_space<vmem>>, vector<24x1xf32>
    %c0_20 = arith.constant 0 : index
    %c16 = arith.constant 16 : index
    %26 = vector.load %arg11[%c0_20, %c16] : memref<24x290xf32, #tpu.memory_space<vmem>>, vector<24x256xf32>
    %27 = vector.broadcast %25 : vector<24x1xf32> to vector<24x256xf32>
    %28 = arith.mulf %27, %26 : vector<24x256xf32>
    %29 = arith.addf %24, %28 : vector<24x256xf32>
    %c0_21 = arith.constant 0 : index
    %c6 = arith.constant 6 : index
    %30 = vector.load %arg5[%c0_21, %c6] : memref<24x9xf32, #tpu.memory_space<vmem>>, vector<24x1xf32>
    %c0_22 = arith.constant 0 : index
    %c32 = arith.constant 32 : index
    %31 = vector.load %arg11[%c0_22, %c32] : memref<24x290xf32, #tpu.memory_space<vmem>>, vector<24x256xf32>
    %32 = vector.broadcast %30 : vector<24x1xf32> to vector<24x256xf32>
    %33 = arith.mulf %32, %31 : vector<24x256xf32>
    %34 = arith.addf %29, %33 : vector<24x256xf32>
    %35 = vector.broadcast %16 : vector<1x256xf32> to vector<24x256xf32>
    %36 = arith.mulf %34, %35 : vector<24x256xf32>
    %37 = arith.addf %20, %36 : vector<24x256xf32>
    %c0_23 = arith.constant 0 : index
    %c1_24 = arith.constant 1 : index
    %38 = vector.load %arg5[%c0_23, %c1_24] : memref<24x9xf32, #tpu.memory_space<vmem>>, vector<24x1xf32>
    %c0_25 = arith.constant 0 : index
    %c1_26 = arith.constant 1 : index
    %39 = vector.load %arg11[%c0_25, %c1_26] : memref<24x290xf32, #tpu.memory_space<vmem>>, vector<24x256xf32>
    %40 = vector.broadcast %38 : vector<24x1xf32> to vector<24x256xf32>
    %41 = arith.mulf %40, %39 : vector<24x256xf32>
    %c0_27 = arith.constant 0 : index
    %c4 = arith.constant 4 : index
    %42 = vector.load %arg5[%c0_27, %c4] : memref<24x9xf32, #tpu.memory_space<vmem>>, vector<24x1xf32>
    %c0_28 = arith.constant 0 : index
    %c17_29 = arith.constant 17 : index
    %43 = vector.load %arg11[%c0_28, %c17_29] : memref<24x290xf32, #tpu.memory_space<vmem>>, vector<24x256xf32>
    %44 = vector.broadcast %42 : vector<24x1xf32> to vector<24x256xf32>
    %45 = arith.mulf %44, %43 : vector<24x256xf32>
    %46 = arith.addf %41, %45 : vector<24x256xf32>
    %c0_30 = arith.constant 0 : index
    %c7 = arith.constant 7 : index
    %47 = vector.load %arg5[%c0_30, %c7] : memref<24x9xf32, #tpu.memory_space<vmem>>, vector<24x1xf32>
    %c0_31 = arith.constant 0 : index
    %c33 = arith.constant 33 : index
    %48 = vector.load %arg11[%c0_31, %c33] : memref<24x290xf32, #tpu.memory_space<vmem>>, vector<24x256xf32>
    %49 = vector.broadcast %47 : vector<24x1xf32> to vector<24x256xf32>
    %50 = arith.mulf %49, %48 : vector<24x256xf32>
    %51 = arith.addf %46, %50 : vector<24x256xf32>
    %52 = arith.addf %37, %51 : vector<24x256xf32>
    %c0_32 = arith.constant 0 : index
    %c2 = arith.constant 2 : index
    %53 = vector.load %arg5[%c0_32, %c2] : memref<24x9xf32, #tpu.memory_space<vmem>>, vector<24x1xf32>
    %c0_33 = arith.constant 0 : index
    %c2_34 = arith.constant 2 : index
    %54 = vector.load %arg11[%c0_33, %c2_34] : memref<24x290xf32, #tpu.memory_space<vmem>>, vector<24x256xf32>
    %55 = vector.broadcast %53 : vector<24x1xf32> to vector<24x256xf32>
    %56 = arith.mulf %55, %54 : vector<24x256xf32>
    %c0_35 = arith.constant 0 : index
    %c5 = arith.constant 5 : index
    %57 = vector.load %arg5[%c0_35, %c5] : memref<24x9xf32, #tpu.memory_space<vmem>>, vector<24x1xf32>
    %c0_36 = arith.constant 0 : index
    %c18 = arith.constant 18 : index
    %58 = vector.load %arg11[%c0_36, %c18] : memref<24x290xf32, #tpu.memory_space<vmem>>, vector<24x256xf32>
    %59 = vector.broadcast %57 : vector<24x1xf32> to vector<24x256xf32>
    %60 = arith.mulf %59, %58 : vector<24x256xf32>
    %61 = arith.addf %56, %60 : vector<24x256xf32>
    %c0_37 = arith.constant 0 : index
    %c8 = arith.constant 8 : index
    %62 = vector.load %arg5[%c0_37, %c8] : memref<24x9xf32, #tpu.memory_space<vmem>>, vector<24x1xf32>
    %c0_38 = arith.constant 0 : index
    %c34 = arith.constant 34 : index
    %63 = vector.load %arg11[%c0_38, %c34] : memref<24x290xf32, #tpu.memory_space<vmem>>, vector<24x256xf32>
    %64 = vector.broadcast %62 : vector<24x1xf32> to vector<24x256xf32>
    %65 = arith.mulf %64, %63 : vector<24x256xf32>
    %66 = arith.addf %61, %65 : vector<24x256xf32>
    %67 = vector.broadcast %17 : vector<1x256xf32> to vector<24x256xf32>
    %68 = arith.mulf %66, %67 : vector<24x256xf32>
    %69 = arith.addf %52, %68 : vector<24x256xf32>
    %cst_39 = arith.constant 0.000000e+00 : f32
    %cst_40 = arith.constant 6.000000e+00 : f32
    %70 = vector.broadcast %cst_39 : f32 to vector<24x256xf32>
    %71 = arith.maximumf %70, %69 : vector<24x256xf32>
    %72 = vector.broadcast %cst_40 : f32 to vector<24x256xf32>
    %73 = arith.minimumf %72, %71 : vector<24x256xf32>
    %c0_41 = arith.constant 0 : index
    %c0_42 = arith.constant 0 : index
    %74 = vector.load %arg7[%c0_41, %c0_42] : memref<4x24xbf16, #tpu.memory_space<vmem>>, vector<4x24xbf16>
    %75 = arith.truncf %73 : vector<24x256xf32> to vector<24x256xbf16>
    %cst_43 = arith.constant dense<0.000000e+00> : vector<4x256xf32>
    %76 = tpu.matmul %74, %75, %cst_43 {dimension_numbers = #tpu.dot_dimension_numbers<[1], [0], [0], [1], [0, 0, 1, 1], [], []>} : vector<4x24xbf16>, vector<24x256xbf16>, vector<4x256xf32> -> vector<4x256xf32>
    %c0_44 = arith.constant 0 : index
    %c0_45 = arith.constant 0 : index
    %77 = vector.load %arg8[%c0_44, %c0_45] : memref<4x1xf32, #tpu.memory_space<vmem>>, vector<4x1xf32>
    %78 = vector.broadcast %77 : vector<4x1xf32> to vector<4x256xf32>
    %79 = arith.addf %76, %78 : vector<4x256xf32>
    %80 = arith.addf %79, %1 : vector<4x256xf32>
    %c0_46 = arith.constant 0 : index
    %c0_47 = arith.constant 0 : index
    %c0_48 = arith.constant 0 : index
    %81 = vector.load %arg10[%c0_46, %c0_47, %c0_48] : memref<1x4x256xf32, #tpu.memory_space<vmem>>, vector<1x4x256xf32>
    %82 = vector.shape_cast %81 : vector<1x4x256xf32> to vector<4x256xf32>
    %83 = vector.shape_cast %80 : vector<4x256xf32> to vector<1x4x256xf32>
    tpu.vector_store %arg10[%c0_46, %c0_47, %c0_48], %83 {strides = array<i32>} : memref<1x4x256xf32, #tpu.memory_space<vmem>>, vector<1x4x256xf32>,
    return
  }
  func.func @transform_0(%arg0: i32, %arg1: i32) -> (i32, i32, i32) {
    %c0_i32 = arith.constant 0 : i32
    %c0_i32_0 = arith.constant 0 : i32
    %c0_i32_1 = arith.constant 0 : i32
    return %arg0, %c0_i32, %c0_i32_0 : i32, i32, i32
  }
  func.func @transform_1(%arg0: i32, %arg1: i32) -> (i32, i32) {
    %c0_i32 = arith.constant 0 : i32
    %c0_i32_0 = arith.constant 0 : i32
    return %arg1, %c0_i32 : i32, i32
  }
  func.func @transform_2(%arg0: i32, %arg1: i32) -> (i32, i32) {
    %c0_i32 = arith.constant 0 : i32
    %c0_i32_0 = arith.constant 0 : i32
    return %arg1, %c0_i32 : i32, i32
  }
  func.func @transform_3(%arg0: i32, %arg1: i32) -> (i32, i32) {
    %c0_i32 = arith.constant 0 : i32
    %c0_i32_0 = arith.constant 0 : i32
    return %arg1, %c0_i32 : i32, i32
  }
  func.func @transform_4(%arg0: i32, %arg1: i32) -> (i32, i32) {
    %c0_i32 = arith.constant 0 : i32
    %c0_i32_0 = arith.constant 0 : i32
    return %arg1, %c0_i32 : i32, i32
  }
  func.func @transform_5(%arg0: i32, %arg1: i32) -> (i32, i32) {
    %c0_i32 = arith.constant 0 : i32
    %c0_i32_0 = arith.constant 0 : i32
    return %c0_i32, %arg1 : i32, i32
  }
  func.func @transform_6(%arg0: i32, %arg1: i32) -> (i32, i32) {
    %c0_i32 = arith.constant 0 : i32
    %c0_i32_0 = arith.constant 0 : i32
    %c0_i32_1 = arith.constant 0 : i32
    return %c0_i32, %c0_i32_0 : i32, i32
  }
  func.func @transform_7(%arg0: i32, %arg1: i32) -> (i32, i32) {
    %c0_i32 = arith.constant 0 : i32
    %c0_i32_0 = arith.constant 0 : i32
    %c0_i32_1 = arith.constant 0 : i32
    return %c0_i32, %c0_i32_0 : i32, i32
  }
  func.func @transform_8(%arg0: i32, %arg1: i32) -> (i32, i32, i32) {
    %c0_i32 = arith.constant 0 : i32
    %c0_i32_0 = arith.constant 0 : i32
    %c0_i32_1 = arith.constant 0 : i32
    return %arg0, %c0_i32, %c0_i32_0 : i32, i32, i32
  }
}

</mosaic_0001>

<bundles_post_ra>
// kernel: tpu_custom_call.1
= control target key start
LH: loop header
LB: loop body
LE: loop exit
PB: predicated region body
PF: predicated region fallthrough
CT: control target
= control target key end

     0   :  { %13 = vsyncpa [#allocation4], 0  ;;  %s2368_s0 = inlined_call_operand.vmem [shape: f32[2,4,256], index: 0, kind: input, shape index: {}]   ;;  %s2369_s1 = inlined_call_operand.vmem [shape: bf16[24,4], index: 1, kind: input, shape index: {}]   ;;  %s2370_s2 = inlined_call_operand.vmem [shape: f32[24,1], index: 2, kind: input, shape index: {}]   ;;  %s2371_s3 = inlined_call_operand.vmem [shape: f32[24,9], index: 3, kind: input, shape index: {}]   ;;  %s2372_s4 = inlined_call_operand.vmem [shape: f32[24,1], index: 4, kind: input, shape index: {}]   ;;  %s2373_s5 = inlined_call_operand.vmem [shape: bf16[4,24], index: 5, kind: input, shape index: {}]   ;;  %s2374_s6 = inlined_call_operand.vmem [shape: f32[4,1], index: 6, kind: input, shape index: {}]   ;;  %s2375_s7 = inlined_call_operand.vmem [shape: f32[2,256], index: 7, kind: input, shape index: {}]   ;;  %s2376_s8 = inlined_call_operand.hbm [shape: f32[2,4,256], index: 8, kind: output, shape index: {}]  }
   0x1   :  { %15 = vsyncpa [#allocation4 + $0x1], 0  ;;  %s1731_s27 = smov 0   ;;  %s1733_s28 = smov 0  }
   0x2   :  { %s1735_s29 = smov 0   ;;  %s1737_s30 = smov 0  }
   0x3   :  { %s1739_s9 = smov 0   ;;  %s1741_s10 = smov 0  }
   0x4 LB: > { %s1461_s11 = sadd.s32 4294967295, %s1668_s10   ;;  %s1462_s12 = sadd.s32 4294967294, %s1668_s10   ;;  %s1668_s10 = sphi %s1741_s10, %s21_s10   ;;  %s1664_s9 = sphi %s1739_s9, %s2383_s9   ;;  %s1660_s30 = sphi %s1737_s30, %s2382_s30   ;;  %s1656_s29 = sphi %s1735_s29, %s2381_s29   ;;  %s1652_s28 = sphi %s1733_s28, %s2380_s28   ;;  %s1648_s27 = sphi %s1731_s27, %s2379_s27  }
   0x5   : > { %s33_s13 = sadd.s32 1, %s1664_s9  ;;  %s238_s14 = sadd.s32 1, %s1656_s29 }
   0x6   : > { %p35_p0 = scmp.ge.s32.totalorder %s33_s13, 2  ;;  %p248_p1 = scmp.ne.s32.totalorder %s1656_s29, %s1652_s28 }
   0x7   : > { %p249_p2 = scmp.eq.s32.totalorder %s1461_s11, 1  ;;  %p254_p3 = scmp.ne.s32.totalorder %s1652_s28, %s1648_s27 }
   0x8   : > { %s2385_s13 = smov (%p35_p0, %s33_s13), 0  ;;  %p255_p5 = scmp.eq.s32.totalorder %s1462_s12, 1 }
   0x9   : > { %p1771_p4 = por %p249_p2, %p248_p1  ;;  %s235_s16 = ssub.s32 %s1664_s9, %s2385_s13 }
   0xa   : > { %p1470_p6 = scmp.ge.s32.totalorder %s1668_s10, 1  ;;  %p236_p7 = scmp.eq.s32.totalorder %s235_s16, 0 }
   0xb   : > { %p1778_p8 = por %p255_p5, %p254_p3  ;;  %p330_p9 = scmp.lt.s32.totalorder %s1668_s10, 3 }
   0xc   : > { %s1784_s18 = scalar_select %p236_p7, %s1656_s29, %s238_s14  }
   0xd   : > { %p331_p10 = pnand %p1470_p6, %p330_p9 }
   0xe   : > { %p388_p11 = scmp.lt.s32.totalorder (!%p331_p10), %s1660_s30, 1  ;;  %s1680_s25 = smov (!%p331_p10), 17  }
   0xf   : > { %334 = sbr.rel (%p331_p10) target bundleno = 842 (0x34a), region = 52  ;;  %s1682_s26 = smov (!%p331_p10), 112  }
  0x10   : > { %s1684_s12 = smov (!%p331_p10), 127   ;;  %s1685_s14 = smov (!%p331_p10), 126  }
  0x14   : > { %v434_v0 = vld [vmem:[%s2370_s2] sm:$0xff]  ;;  %v1670_v1 = vmov 0   ;;  %v436_v2 = vld [vmem:[%s2370_s2 + $0x10] sm:$0xff]  ;;  %s389_s23 = scalar_select %p388_p11, %s1660_s30, 1  ;;  %v435_v5 = vld [vmem:[%s2370_s2 + $0x8] sm:$0xff]  ;;  %vm467_vm0 = vcmask 1041408  }
  0x15   : > { %1564 = vset.pattern.permute.xlu0 %v1670_v1  ;;  %1565 = vset.pattern.permute.xlu1 %v1670_v1  ;;  %v580_v3 = vld [vmem:[%s2372_s4 + $0x10] sm:$0xff]  ;;  %v579_v6 = vld [vmem:[%s2372_s4 + $0x8] sm:$0xff]  ;;  %v578_v12 = vld [vmem:[%s2372_s4] sm:$0xff]  ;;  %vm460_vm1 = vcmask 31744   ;;  %v1671_v17 = vmov 3   ;;  %v1672_v21 = vmov 6  }
  0x16   : > { %439 = vperm.xlu0 %1564, %v434_v0   ;;  %449 = vperm.xlu1 %1565, %v436_v2   ;;  %s1490_s24 = sshll.u32 %s389_s23, 3  ;;  %v1812_v7 = vld [vmem:[%s2371_s3 + $0x10] sm:$0xff]  ;;  %v1821_v13 = vld [vmem:[%s2371_s3 + $0x8] sm:$0xff]  ;;  %v1491_v16 = vld [vmem:[%s2369_s1] sm:$0xff]  ;;  %v1673_v23 = vmov 4   ;;  %v1674_v24 = vmov 7  }
  0x17   : > { %1566 = vset.pattern.permute.xlu2 %v1670_v1  ;;  %s392_s11 = scalar_lea.vmem %s2368_s0, %s1490_s24  ;;  %v596_v18 = vld [vmem:[%s2371_s3] sm:$0xff]  ;;  %v425_v19 = vld [vmem:[%s2369_s1 + $0x8] sm:$0xf]  ;;  %v1675_v25 = vmov 8   ;;  %v1676_v26 = vmov 5   ;;  %v1677_v27 = vmov 1  }
  0x18   : > { %v422_v4 = vld [vmem:[%s392_s11] sm:$0xff]  ;;  %593 = vperm.xlu2 %1566, %v580_v3   ;;  %v457_v20 = vunpack.c.l.b16 %v425_v19  ;;  %v1678_v28 = vmov 2   ;;  %s1679_s24 = smov 2   ;;  %vm530_vm2 = vcmask 277640   ;;  %vm526_vm3 = vcmask 138240   ;;  %s1683_s11 = smov 96  }
  0x19   : > { %427 = vst [vmem:[#allocation1] ss:$2 sm:$0xff] %v422_v4  ;;  %v1482_v29 = vld [vmem:[%s2375_s7 + $0x1] ss:$2 sm:$0x3]  ;;  %vm565_vm4 = vcmask 1047688  }
  0x1a   : > { %v459_v22 = vpack.c.b16 %v457_v20, %v457_v20  ;;  %v1163_v30 = vperm.slane %v1482_v29, 0  ;;  %v1164_v31 = vperm.slane %v1482_v29, 1  ;;  %vm683_vm5 = vcmask 916480  }
  0x1b   : > { %vm750_vm6 = vcmask 785408   ;;  %vm1169_vm7 = vcmask 15360   ;;  %vm978_vm8 = vcmask 1039360   ;;  %vm1210_vm9 = vcmask 1031168  }
  0x1c   : > { %vm1256_vm10 = vcmask 1043456   ;;  %vm1252_vm11 = vcmask 195584  }
  0x1e   : > { %444 = vperm.xlu0 %1564, %v435_v5   ;;  %588 = vperm.xlu1 %1565, %v579_v6   ;;  %v1681_v5 = vmov 0.0  }
  0x1f   : > { %531 = vst.msk [vmem:[#allocation2 + $0x10] sm:$0xff] %vm530_vm2, %v1681_v5 }
  0x20   : > { %v428_v8 = vld.sshfl [vmem:[#allocation1] sm:$0xff pattern:$0x75316420]  ;;  %v429_v9 = vld.sshfl [vmem:[#allocation1 + $0x8] sm:$0xff pattern:$0x75316420]  ;;  %617 = vperm.xlu2 %1566, %v1812_v7  }
  0x21   : > { %v432_v10 = vpack.c.bf16 %v428_v8, %v428_v8  ;;  %v433_v11 = vpack.c.bf16 %v429_v9, %v429_v9  ;;  %1289 = vst [vmem:[#allocation1] ss:$2 sm:$0xff] %v422_v4 }
  0x22   : > { %527 = vst.msk [vmem:[#allocation2] sm:$0xff] %vm526_vm3, %v1681_v5 }
  0x23   : > { %v469_v14 = vsel %vm467_vm0, %v432_v10, 0  ;;  %v472_v15 = vsel %vm467_vm0, %v433_v11, 0  ;;  %528 = vst.msk [vmem:[#allocation2 + $0x18] sm:$0xff] %vm526_vm3, %v1681_v5 }
  0x24   : > { %481 = vmatpush.bf16.msra.mxu0 %v469_v14  ;;  %499 = vmatpush.bf16.msra.mxu1 %v472_v15  ;;  %529 = vst.msk [vmem:[#allocation2 + $0x30] sm:$0xff] %vm526_vm3, %v1681_v5 }
  0x25   : > { %532 = vst.msk [vmem:[#allocation2 + $0x28] sm:$0xff] %vm530_vm2, %v1681_v5 }
  0x26   : > { %583 = vperm.xlu0 %1564, %v578_v12   ;;  %612 = vperm.xlu1 %1565, %v1821_v13   ;;  %533 = vst.msk [vmem:[#allocation2 + $0x40] sm:$0xff] %vm530_vm2, %v1681_v5 }
  0x27   : > { %1478 = vmatmul.msk.bf16.vlgmr.msra.gmra.mxu0 %vm460_vm1, %v1491_v16  ;;  %1480 = vmatmul.msk.bf16.vlgmr.msra.gmra.mxu1 %vm460_vm1, %v1491_v16 }
  0x28   : > { %1569 = vset.pattern.permute.xlu2 %v1671_v17 }
  0x29   : > { %644 = vperm.xlu2 %1569, %v1812_v7  }
  0x2e   : > { %607 = vperm.xlu0 %1564, %v596_v18   ;;  %1568 = vset.pattern.permute.xlu1 %v1671_v17 }
  0x2f   : > { %640 = vperm.xlu1 %1568, %v1821_v13  }
  0x31   : > { %1571 = vset.pattern.permute.xlu2 %v1672_v21 }
  0x32   : > { %707 = vperm.xlu2 %1571, %v1821_v13  }
  0x36   : > { %1567 = vset.pattern.permute.xlu0 %v1671_v17 }
  0x37   : > { %1570 = vset.pattern.permute.xlu1 %v1672_v21  ;;  %636 = vperm.xlu0 %1567, %v596_v18  }
  0x38   : > { %1479 = vmatmul.msk.bf16.gmra.mxu0 %vm460_vm1, %v459_v22  ;;  %1481 = vmatmul.msk.bf16.gmra.mxu1 %vm460_vm1, %v459_v22 }
  0x39   : > { %703 = vperm.xlu1 %1570, %v596_v18  }
  0x3a   : > { %1573 = vset.pattern.permute.xlu2 %v1673_v23 }
  0x3b   : > { %816 = vperm.xlu2 %1573, %v1812_v7  }
  0x3f   : > { %1572 = vset.pattern.permute.xlu0 %v1672_v21 }
  0x40   : > { %711 = vperm.xlu0 %1572, %v1812_v7  }
  0x41   : > { %1575 = vset.pattern.permute.xlu1 %v1674_v24 }
  0x42   : > { %888 = vperm.xlu1 %1575, %v1812_v7  }
  0x43   : > { %1576 = vset.pattern.permute.xlu2 %v1675_v25 }
  0x44   : > { %1099 = vperm.xlu2 %1576, %v1812_v7  }
  0x48   : > { %1574 = vset.pattern.permute.xlu0 %v1676_v26 }
  0x49   : > { %1027 = vperm.xlu0 %1574, %v1812_v7  }
  0x4a   : > { %1577 = vset.pattern.permute.xlu1 %v1673_v23 }
  0x4b   : > { %808 = vperm.xlu1 %1577, %v596_v18  }
  0x4c   : > { %1578 = vset.pattern.permute.xlu2 %v1673_v23 }
  0x4d   : > { %812 = vperm.xlu2 %1578, %v1821_v13  }
  0x51   : > { %1019 = vperm.xlu0 %1574, %v596_v18  }
  0x53   : > { %1579 = vset.pattern.permute.xlu1 %v1676_v26 }
  0x54   : > { %1023 = vperm.xlu1 %1579, %v1821_v13  }
  0x55   : > { %1580 = vset.pattern.permute.xlu2 %v1674_v24 }
  0x56   : > { %880 = vperm.xlu2 %1580, %v596_v18  }
  0x59   : > { %1581 = vset.pattern.permute.xlu0 %v1674_v24 }
  0x5a   : > { %884 = vperm.xlu0 %1581, %v1821_v13  }
  0x5c   : > { %1582 = vset.pattern.permute.xlu1 %v1675_v25 }
  0x5d   : > { %1091 = vperm.xlu1 %1582, %v596_v18  }
  0x5e   : > { %1583 = vset.pattern.permute.xlu2 %v1675_v25 }
  0x5f   : > { %1095 = vperm.xlu2 %1583, %v1821_v13  }
  0x62   : > { %1586 = vset.pattern.permute.xlu0 %v1677_v27 }
  0x63   : > { %787 = vperm.xlu0 %1586, %v596_v18  }
  0x65   : > { %1584 = vset.pattern.permute.xlu1 %v1677_v27 }
  0x66   : > { %795 = vperm.xlu1 %1584, %v1812_v7  }
  0x67   : > { %1585 = vset.pattern.permute.xlu2 %v1678_v28 }
  0x68   : > { %1006 = vperm.xlu2 %1585, %v1812_v7  }
  0x6b   : > { %1589 = vset.pattern.permute.xlu0 %v1670_v1 }
  0x6c   : > { %1167 = vrot.lane.b32.xlu0 %v1164_v31, %s1679_s24 }
  0x6e   : > { %791 = vperm.xlu1 %1584, %v1821_v13  }
  0x70   : > { %998 = vperm.xlu2 %1585, %v596_v18  }
  0x72   : > { %v1858_v32 = vpop.permute.xlu2 %593 }
  0x76   : > { %1587 = vset.pattern.permute.xlu1 %v1678_v28 }
  0x77   : > { %1002 = vperm.xlu1 %1587, %v1821_v13  }
  0x78   : > { %1165 = vrot.lane.b32.xlu2 %v1163_v30, %s1679_s24  ;;  %s385_s24 = sand.u32 1, %s1652_s28  }
  0x7a   : > { %v1860_v33 = vpop.permute.xlu2 %617 }
  0x7f   : > { %1588 = vset.pattern.permute.xlu1 %v1670_v1 }
  0x83   : > { %v1862_v35 = vpop.permute.xlu2 %644 }
  0x88   : > { %v440_v34 = vpop.permute.xlu0 %439  ;;  %v450_v44 = vpop.permute.xlu1 %449 }
  0x8c   : > { %v1864_v46 = vpop.permute.xlu2 %707 }
  0x90   : > { %v445_v45 = vpop.permute.xlu0 %444  ;;  %v1866_v55 = vpop.permute.xlu1 %588 }
  0x95   : > { %v1868_v60 = vpop.permute.xlu2 %816 }
  0x98   : > { %v1870_v2 = vpop.permute.xlu1 %612  ;;  %v1879_v7 = vpop.permute.xlu0 %583 }
  0x9e   : > { %v1872_v4 = vpop.permute.xlu2 %1099 }
  0xa0   : > { %v1885_v10 = vpop.permute.xlu0 %607 }
  0xa1   : > { %v1877_v6 = vpop.permute.xlu1 %640 }
  0xa4   : > { %v483_v36 = vpop.f32.mrf.mxu0  ;;  %v501_v37 = vpop.f32.mrf.mxu1 }
  0xa5   : > { %v484_v38 = vadd.f32 %v483_v36, %v440_v34  ;;  %v502_v39 = vadd.f32 %v501_v37, %v440_v34 }
  0xa7   : > { %v510_v40 = vmax.f32 %v484_v38, 0.0  ;;  %v511_v41 = vmax.f32 %v502_v39, 0.0  ;;  %v1881_v8 = vpop.permute.xlu2 %812 }
  0xa9   : > { %v516_v42 = vmin.f32 %v510_v40, 6.0  ;;  %v517_v43 = vmin.f32 %v511_v41, 6.0  ;;  %v1891_v13 = vpop.permute.xlu0 %636 }
  0xab   : > { %542 = vrot.lane.b32.xlu2 %v517_v43, %s1680_s25  ;;  %540 = vrot.lane.b32.xlu1 %v516_v42, %s1680_s25  ;;  %v1883_v9 = vpop.permute.xlu1 %703 }
  0xac   : > { %v485_v47 = vpop.f32.mrf.mxu0  ;;  %v503_v48 = vpop.f32.mrf.mxu1 }
  0xad   : > { %v486_v49 = vadd.f32 %v485_v47, %v445_v45  ;;  %v504_v50 = vadd.f32 %v503_v48, %v445_v45 }
  0xaf   : > { %v512_v51 = vmax.f32 %v486_v49, 0.0  ;;  %v513_v52 = vmax.f32 %v504_v50, 0.0 }
  0xb0   : > { %v1887_v11 = vpop.permute.xlu2 %880 }
  0xb1   : > { %v518_v53 = vmin.f32 %v512_v51, 6.0  ;;  %v519_v54 = vmin.f32 %v513_v52, 6.0 }
  0xb2   : > { %v1897_v16 = vpop.permute.xlu0 %711 }
  0xb3   : > { %546 = vrot.lane.b32.xlu0 %v519_v54, %s1680_s25  ;;  %544 = vrot.lane.b32.xlu2 %v518_v53, %s1680_s25 }
  0xb4   : > { %v1889_v12 = vpop.permute.xlu1 %888 }
  0xb5   : > { %v488_v56 = vpop.f32.mrf.mxu0  ;;  %v506_v57 = vpop.f32.mrf.mxu1 }
  0xb6   : > { %v489_v58 = vadd.f32 %v488_v56, %v450_v44  ;;  %v507_v59 = vadd.f32 %v506_v57, %v450_v44 }
  0xb8   : > { %v514_v61 = vmax.f32 %v489_v58, 0.0  ;;  %v515_v62 = vmax.f32 %v507_v59, 0.0 }
  0xb9   : > { %v1893_v14 = vpop.permute.xlu2 %1095 }
  0xba   : > { %v520_v63 = vmin.f32 %v514_v61, 6.0  ;;  %v521_v0 = vmin.f32 %v515_v62, 6.0 }
  0xbb   : > { %v1903_v19 = vpop.permute.xlu0 %1027 }
  0xbc   : > { %550 = vrot.lane.b32.xlu2 %v521_v0, %s1680_s25  ;;  %548 = vrot.lane.b32.xlu1 %v520_v63, %s1680_s25  ;;  %s1471_s25 = sshll.u32 %s385_s24, 3 }
  0xbd   : > { %v490_v1 = vpop.f32.mrf.mxu0  ;;  %v508_v3 = vpop.f32.mrf.mxu1  ;;  %s387_s16 = scalar_lea.vmem [#allocation3], %s1471_s25  ;;  %s1610_s25 = scalar_lea.hbm %s2376_s8, 16 }
  0xbe   : > { %v1895_v15 = vpop.permute.xlu1 %808  ;;  %s1316_s19 = sshll.u32 %s387_s16, 4  ;;  %s1317_s19 = int_to_ptr.vmem [resolvable:$true] %s1316_s19 }
  0xc2   : > { %v1899_v17 = vpop.permute.xlu2 %1006 }
  0xc3   : > { %v1909_v22 = vpop.permute.xlu0 %1019 }
  0xc6   : > { %v1901_v18 = vpop.permute.xlu1 %1023 }
  0xca   : > { %v1905_v20 = vpop.permute.xlu2 %998 }
  0xcc   : > { %v1915_v25 = vpop.permute.xlu0 %884 }
  0xcf   : > { %v1907_v21 = vpop.permute.xlu1 %1091 }
  0xd2   : > { %v1911_v23 = vpop.permute.xlu2 %1165 }
  0xd5   : > { %v788_v28 = vpop.permute.xlu0 %787 }
  0xd8   : > { %v1913_v24 = vpop.permute.xlu1 %795 }
  0xde   : > { %v1941_v42 = vpop.permute.xlu0 %1167 }
  0xe0   : > { %v1918_v27 = vpop.permute.xlu1 %791 }
  0xe9   : > { %v1003_v37 = vpop.permute.xlu1 %1002 }
 0x105   : > { %v543_v26 = vpop.permute.xlu2 %542 }
 0x106   : > { %568 = vst.msk [vmem:[#allocation2 + $0x10] sm:$0xff] %vm526_vm3, %v543_v26 }
 0x10d   : > { %v1920_v29 = vld [vmem:[#allocation2 + $0x10] sm:$0xff]  ;;  %v545_v30 = vpop.permute.xlu2 %544 }
 0x10e   : > { %v1923_v31 = vmul.f32 %v788_v28, %v1920_v29  ;;  %569 = vst.msk [vmem:[#allocation2 + $0x18] sm:$0xff] %vm565_vm4, %v545_v30  ;;  %v649_v34 = vmul.f32 %v1891_v13, %v1920_v29  ;;  %v821_v36 = vmul.f32 %v1895_v15, %v1920_v29  ;;  %v1032_v41 = vmul.f32 %v1909_v22, %v1920_v29 }
 0x10f   : > { %v893_v58 = vmul.f32 %v1887_v11, %v1920_v29  ;;  %v1104_v59 = vmul.f32 %v1907_v21, %v1920_v29  ;;  %v716_v3 = vmul.f32 %v1883_v9, %v1920_v29 }
 0x110   : > { %669 = vrot.lane.b32.xlu0 %v649_v34, %s1682_s26  ;;  %841 = vrot.lane.b32.xlu2 %v821_v36, %s1682_s26 }
 0x115   : > { %v1932_v38 = vld [vmem:[#allocation2 + $0x18] sm:$0xff] }
 0x116   : > { %v551_v39 = vpop.permute.xlu2 %550  ;;  %v1935_v40 = vmul.f32 %v1003_v37, %v1932_v38  ;;  %v650_v36 = vmul.f32 %v1877_v6, %v1932_v38 }
 0x117   : > { %574 = vst.msk [vmem:[#allocation2 + $0x40] sm:$0xff] %vm526_vm3, %v551_v39 }
 0x118   : > { %1052 = vrot.lane.b32.xlu0 %v1032_v41, %s1682_s26 }
 0x11d   : > { %v541_v43 = vpop.permute.xlu1 %540 }
 0x11e   : > { %v1944_v44 = vsel %vm526_vm3, %v541_v43, %v543_v26  ;;  %566 = vst.msk [vmem:[#allocation2] sm:$0xff] %vm565_vm4, %v541_v43 }
 0x11f   : > { %v1948_v45 = vmul.f32 %v788_v28, %v1944_v44  ;;  %v648_v1 = vmul.f32 %v1891_v13, %v1944_v44  ;;  %v715_v26 = vmul.f32 %v1883_v9, %v1944_v44  ;;  %v892_v34 = vmul.f32 %v1887_v11, %v1944_v44 }
 0x125   : > { %v547_v47 = vpop.permute.xlu0 %546  ;;  %v1950_v48 = vld [vmem:[#allocation2] sm:$0xff] }
 0x126   : > { %v1953_v49 = vsel %vm526_vm3, %v545_v30, %v547_v47  ;;  %571 = vst.msk [vmem:[#allocation2 + $0x28] sm:$0xff] %vm526_vm3, %v547_v47  ;;  %v1030_v50 = vmul.f32 %v1909_v22, %v1950_v48  ;;  %v819_v51 = vmul.f32 %v1895_v15, %v1950_v48  ;;  %v647_v52 = vmul.f32 %v1891_v13, %v1950_v48 }
 0x127   : > { %v1966_v53 = vmul.f32 %v788_v28, %v1950_v48  ;;  %v1969_v54 = vmul.f32 %v1003_v37, %v1953_v49  ;;  %v714_v62 = vmul.f32 %v1883_v9, %v1950_v48  ;;  %v891_v0 = vmul.f32 %v1887_v11, %v1950_v48 }
 0x128   : > { %1048 = vrot.lane.b32.xlu2 %v1030_v50, %s1682_s26  ;;  %837 = vrot.lane.b32.xlu0 %v819_v51, %s1682_s26  ;;  %v820_v28 = vmul.f32 %v1895_v15, %v1944_v44  ;;  %v1033_v13 = vmul.f32 %v1901_v18, %v1932_v38  ;;  %v1031_v30 = vmul.f32 %v1909_v22, %v1944_v44 }
 0x129   : > { %665 = vrot.lane.b32.xlu1 %v647_v52, %s1682_s26  ;;  %v718_v9 = vmul.f32 %v1864_v46, %v1953_v49  ;;  %v1103_v15 = vmul.f32 %v1907_v21, %v1944_v44  ;;  %v823_v11 = vmul.f32 %v1881_v8, %v1953_v49  ;;  %v717_v22 = vmul.f32 %v1864_v46, %v1932_v38 }
 0x12a   : > { %v822_v51 = vmul.f32 %v1881_v8, %v1932_v38 }
 0x12d   : > { %v1979_v61 = vld [vmem:[#allocation2 + $0x28] sm:$0xff] }
 0x12e   : > { %v549_v56 = vpop.permute.xlu1 %548  ;;  %v1987_v63 = vmul.f32 %v1003_v37, %v1979_v61  ;;  %v652_v5 = vmul.f32 %v1877_v6, %v1979_v61  ;;  %v719_v37 = vmul.f32 %v1864_v46, %v1979_v61  ;;  %v1035_v41 = vmul.f32 %v1901_v18, %v1979_v61  ;;  %v2043_v46 = vld [vmem:[#allocation2 + $0x40] sm:$0xff] }
 0x12f   : > { %v1972_v57 = vsel %vm526_vm3, %v549_v56, %v551_v39  ;;  %572 = vst.msk [vmem:[#allocation2 + $0x30] sm:$0xff] %vm565_vm4, %v549_v56  ;;  %v895_v39 = vmul.f32 %v1915_v25, %v1953_v49  ;;  %v824_v43 = vmul.f32 %v1881_v8, %v1979_v61  ;;  %v655_v47 = vmul.f32 %v1862_v35, %v2043_v46 }
 0x130   : > { %913 = vrot.lane.b32.xlu2 %v893_v58, %s1683_s11  ;;  %1124 = vrot.lane.b32.xlu0 %v1104_v59, %s1683_s11  ;;  %v1107_v50 = vmul.f32 %v1893_v14, %v1979_v61  ;;  %v1038_v52 = vmul.f32 %v1903_v19, %v2043_v46  ;;  %v651_v56 = vmul.f32 %v1877_v6, %v1953_v49 }
 0x131   : > { %732 = vrot.lane.b32.xlu1 %v714_v62, %s1683_s11  ;;  %v896_v58 = vmul.f32 %v1915_v25, %v1979_v61  ;;  %v1110_v59 = vmul.f32 %v1872_v4, %v2043_v46  ;;  %v894_v6 = vmul.f32 %v1915_v25, %v1932_v38 }
 0x136   : > { %v2063_v8 = vld [vmem:[#allocation2 + $0x30] sm:$0xff] }
 0x137   : > { %v720_v62 = vmul.f32 %v1897_v16, %v2063_v8 }
 0x138   : > { %909 = vrot.lane.b32.xlu0 %v891_v0, %s1683_s11  ;;  %667 = vrot.lane.b32.xlu2 %v648_v1, %s1682_s26  ;;  %v1036_v1 = vmul.f32 %v1903_v19, %v2063_v8 }
 0x139   : > { %736 = vrot.lane.b32.xlu1 %v716_v3, %s1683_s11  ;;  %v721_v3 = vmul.f32 %v1897_v16, %v1972_v57 }
 0x140   : > { %675 = vrot.lane.b32.xlu0 %v652_v5, %s1682_s26  ;;  %734 = vrot.lane.b32.xlu2 %v715_v26, %s1683_s11  ;;  %v1034_v5 = vmul.f32 %v1901_v18, %v1953_v49  ;;  %v1108_v26 = vmul.f32 %v1872_v4, %v2063_v8 }
 0x141   : > { %839 = vrot.lane.b32.xlu1 %v820_v28, %s1682_s26  ;;  %v826_v28 = vmul.f32 %v1868_v60, %v1972_v57 }
 0x148   : > { %1054 = vrot.lane.b32.xlu0 %v1033_v13, %s1682_s26  ;;  %1050 = vrot.lane.b32.xlu2 %v1031_v30, %s1682_s26  ;;  %v1106_v13 = vmul.f32 %v1893_v14, %v1953_v49 }
 0x149   : > { %911 = vrot.lane.b32.xlu1 %v892_v34, %s1683_s11  ;;  %v898_v34 = vmul.f32 %v1889_v12, %v1972_v57 }
 0x150   : > { %740 = vrot.lane.b32.xlu0 %v718_v9, %s1683_s11  ;;  %1122 = vrot.lane.b32.xlu2 %v1103_v15, %s1683_s11  ;;  %v654_v9 = vmul.f32 %v1862_v35, %v1972_v57  ;;  %v653_v15 = vmul.f32 %v1862_v35, %v2063_v8  ;;  %v1037_v35 = vmul.f32 %v1903_v19, %v1972_v57 }
 0x151   : > { %671 = vrot.lane.b32.xlu1 %v650_v36, %s1682_s26  ;;  %v1109_v19 = vmul.f32 %v1872_v4, %v1972_v57 }
 0x158   : > { %845 = vrot.lane.b32.xlu0 %v823_v11, %s1682_s26  ;;  %738 = vrot.lane.b32.xlu2 %v717_v22, %s1683_s11  ;;  %v621_v22 = vmul.f32 %v1885_v10, %v1944_v44 }
 0x159   : > { %742 = vrot.lane.b32.xlu1 %v719_v37, %s1683_s11 }
 0x160   : > { %917 = vrot.lane.b32.xlu0 %v895_v39, %s1683_s11  ;;  %1058 = vrot.lane.b32.xlu2 %v1035_v41, %s1682_s26  ;;  %v1105_v41 = vmul.f32 %v1893_v14, %v1932_v38 }
 0x161   : > { %847 = vrot.lane.b32.xlu1 %v824_v43, %s1682_s26  ;;  %v722_v43 = vmul.f32 %v1897_v16, %v2043_v46  ;;  %v827_v16 = vmul.f32 %v1868_v60, %v2043_v46 }
 0x168   : > { %681 = vrot.lane.b32.xlu0 %v655_v47, %s1682_s26  ;;  %1130 = vrot.lane.b32.xlu2 %v1107_v50, %s1683_s11 }
 0x169   : > { %843 = vrot.lane.b32.xlu1 %v822_v51, %s1682_s26  ;;  %v620_v51 = vmul.f32 %v1950_v48, %v1885_v10 }
 0x16a   : > { %v2074_v0 = vpop.permute.xlu2 %841 }
 0x170   : > { %1064 = vrot.lane.b32.xlu0 %v1038_v52, %s1682_s26  ;;  %673 = vrot.lane.b32.xlu2 %v651_v56, %s1682_s26 }
 0x171   : > { %919 = vrot.lane.b32.xlu1 %v896_v58, %s1683_s11 }
 0x178   : > { %1136 = vrot.lane.b32.xlu0 %v1110_v59, %s1683_s11  ;;  %744 = vrot.lane.b32.xlu2 %v720_v62, %s1683_s11  ;;  %v1009_v59 = vmul.f32 %v1905_v20, %v1950_v48 }
 0x179   : > { %915 = vrot.lane.b32.xlu1 %v894_v6, %s1683_s11 }
 0x180   : > { %1060 = vrot.lane.b32.xlu2 %v1036_v1, %s1682_s26  ;;  %746 = vrot.lane.b32.xlu0 %v721_v3, %s1683_s11 }
 0x181   : > { %1056 = vrot.lane.b32.xlu1 %v1034_v5, %s1682_s26  ;;  %v1102_v5 = vmul.f32 %v1907_v21, %v1950_v48 }
 0x182   : > { %v1049_v25 = vpop.permute.xlu2 %1048  ;;  %v670_v30 = vpop.permute.xlu0 %669 }
 0x188   : > { %1132 = vrot.lane.b32.xlu2 %v1108_v26, %s1683_s11  ;;  %851 = vrot.lane.b32.xlu0 %v826_v28, %s1682_s26  ;;  %v825_v26 = vmul.f32 %v1868_v60, %v2063_v8  ;;  %v899_v60 = vmul.f32 %v1889_v12, %v2043_v46 }
 0x189   : > { %1128 = vrot.lane.b32.xlu1 %v1106_v13, %s1683_s11 }
 0x18a   : > { %v2094_v18 = vpop.permute.xlu2 %913  ;;  %v2105_v36 = vpop.permute.xlu0 %1052 }
 0x190   : > { %923 = vrot.lane.b32.xlu0 %v898_v34, %s1683_s11  ;;  %679 = vrot.lane.b32.xlu2 %v654_v9, %s1682_s26 }
 0x191   : > { %677 = vrot.lane.b32.xlu1 %v653_v15, %s1682_s26 }
 0x192   : > { %v668_v11 = vpop.permute.xlu2 %667 }
 0x193   : > { %v685_v37 = vsel %vm683_vm5, %v668_v11, %v670_v30  ;;  %v872_v30 = vadd.f32 %v2074_v0, %v1923_v31  ;;  %v897_v31 = vmul.f32 %v1889_v12, %v2063_v8 }
 0x194   : > { %v697_v39 = vadd.f32 %v685_v37, %v621_v22 }
 0x195   : > { %v944_v21 = vadd.f32 %v2094_v18, %v872_v30 }
 0x198   : > { %1126 = vrot.lane.b32.xlu0 %v1105_v41, %s1683_s11  ;;  %1062 = vrot.lane.b32.xlu2 %v1037_v35, %s1682_s26 }
 0x199   : > { %748 = vrot.lane.b32.xlu1 %v722_v43, %s1683_s11 }
 0x19a   : > { %v838_v47 = vpop.permute.xlu0 %837  ;;  %v735_v50 = vpop.permute.xlu2 %734 }
 0x19b   : > { %v666_v52 = vpop.permute.xlu1 %665 }
 0x19c   : > { %v684_v14 = vsel %vm683_vm5, %v666_v52, %v668_v11 }
 0x19d   : > { %v696_v56 = vadd.f32 %v684_v14, %v620_v51 }
 0x1a0   : > { %1134 = vrot.lane.b32.xlu2 %v1109_v19, %s1683_s11 }
 0x1a1   : > { %853 = vrot.lane.b32.xlu1 %v827_v16, %s1682_s26 }
 0x1a2   : > { %v1125_v58 = vpop.permute.xlu0 %1124  ;;  %v1051_v10 = vpop.permute.xlu2 %1050 }
 0x1a3   : > { %v1066_v62 = vsel %vm683_vm5, %v1049_v25, %v1051_v10  ;;  %v733_v6 = vpop.permute.xlu1 %732  ;;  %v1067_v14 = vsel %vm683_vm5, %v1051_v10, %v2105_v36 }
 0x1a4   : > { %v2131_v1 = vadd.f32 %v1066_v62, %v1009_v59  ;;  %v751_v4 = vsel %vm750_vm6, %v733_v6, %v735_v50  ;;  %v2191_v62 = vsel %vm1169_vm7, %v1911_v23, %v1941_v42 }
 0x1a5   : > { %v2134_v3 = vadd.f32 %v751_v4, %v696_v56  ;;  %v622_v4 = vmul.f32 %v1932_v38, %v1870_v2 }
 0x1a8   : > { %1120 = vrot.lane.b32.xlu2 %v1102_v5, %s1683_s11  ;;  %v623_v5 = vmul.f32 %v1870_v2, %v1953_v49 }
 0x1a9   : > { %849 = vrot.lane.b32.xlu1 %v825_v26, %s1682_s26  ;;  %s1492_s26 = sshll.u32 %s1660_s30, 3  ;;  %s1303_s30 = scalar_lea.sflag [#allocation4], %s385_s24 }
 0x1aa   : > { %v910_v28 = vpop.permute.xlu0 %909  ;;  %v2142_v13 = vpop.permute.xlu2 %1122 }
 0x1ab   : > { %v737_v25 = vpop.permute.xlu1 %736 }
 0x1ac   : > { %v752_v34 = vsel %vm750_vm6, %v735_v50, %v737_v25 }
 0x1ad   : > { %v2147_v9 = vadd.f32 %v752_v34, %v697_v39 }
 0x1b0   : > { %964 = vrot.lane.b32.xlu2 %v944_v21, %s1684_s12 }
 0x1b1   : > { %925 = vrot.lane.b32.xlu1 %v899_v60, %s1683_s11 }
 0x1b2   : > { %v676_v48 = vpop.permute.xlu0 %675  ;;  %v739_v15 = vpop.permute.xlu2 %738 }
 0x1b3   : > { %v840_v11 = vpop.permute.xlu1 %839 }
 0x1b4   : > { %v855_v22 = vsel %vm683_vm5, %v838_v47, %v840_v11  ;;  %v856_v37 = vsel %vm683_vm5, %v840_v11, %v2074_v0  ;;  %v1011_v47 = vmul.f32 %v1905_v20, %v1920_v29 }
 0x1b5   : > { %v870_v35 = vadd.f32 %v855_v22, %v1966_v53  ;;  %v871_v0 = vadd.f32 %v856_v37, %v1948_v45 }
 0x1b6   : > { %v1083_v53 = vadd.f32 %v2105_v36, %v1011_v47 }
 0x1b8   : > { %v1155_v19 = vadd.f32 %v1125_v58, %v1083_v53 }
 0x1b9   : > { %921 = vrot.lane.b32.xlu1 %v897_v31, %s1683_s11 }
 0x1ba   : > { %v2160_v39 = vpop.permute.xlu0 %1054  ;;  %v2162_v41 = vpop.permute.xlu2 %1058 }
 0x1bb   : > { %v1086_v43 = vadd.f32 %v2162_v41, %v1987_v63  ;;  %v912_v50 = vpop.permute.xlu1 %911  ;;  %v1010_v63 = vmul.f32 %v1905_v20, %v1944_v44  ;;  %v1176_v44 = vmul.f32 %v1941_v42, %v1155_v19 }
 0x1bc   : > { %v927_v51 = vsel %vm750_vm6, %v910_v28, %v912_v50  ;;  %v928_v12 = vsel %vm750_vm6, %v912_v50, %v2094_v18  ;;  %v1139_v18 = vsel %vm750_vm6, %v2142_v13, %v1125_v58  ;;  %v803_v50 = vmul.f32 %v1918_v27, %v1979_v61 }
 0x1bd   : > { %v942_v52 = vadd.f32 %v927_v51, %v870_v35  ;;  %v943_v56 = vadd.f32 %v928_v12, %v871_v0  ;;  %v1082_v16 = vadd.f32 %v1067_v14, %v1010_v63  ;;  %v802_v51 = vmul.f32 %v1918_v27, %v1953_v49 }
 0x1bf   : > { %960 = vrot.lane.b32.xlu2 %v942_v52, %s1684_s12  ;;  %v1154_v59 = vadd.f32 %v1139_v18, %v1082_v16  ;;  %v801_v18 = vmul.f32 %v1918_v27, %v1932_v38  ;;  %v625_v16 = vmul.f32 %v1860_v33, %v1972_v57 }
 0x1c1   : > { %962 = vrot.lane.b32.xlu1 %v943_v56, %s1684_s12  ;;  %v1175_v58 = vmul.f32 %v2191_v62, %v1154_v59 }
 0x1c2   : > { %v741_v29 = vpop.permute.xlu0 %740  ;;  %v2182_v45 = vpop.permute.xlu2 %1130 }
 0x1c3   : > { %v753_v36 = vsel %vm750_vm6, %v739_v15, %v741_v29  ;;  %v2186_v10 = vadd.f32 %v2182_v45, %v1086_v43  ;;  %v672_v20 = vpop.permute.xlu1 %671 }
 0x1c7   : > { %1196 = vrot.lane.b32.xlu2 %v1176_v44, %s1685_s14 }
 0x1c9   : > { %1194 = vrot.lane.b32.xlu1 %v1175_v58, %s1685_s14 }
 0x1ca   : > { %v846_v6 = vpop.permute.xlu0 %845  ;;  %v674_v26 = vpop.permute.xlu2 %673 }
 0x1cb   : > { %v686_v28 = vsel %vm683_vm5, %v672_v20, %v674_v26  ;;  %v687_v25 = vsel %vm683_vm5, %v674_v26, %v676_v48  ;;  %v743_v30 = vpop.permute.xlu1 %742 }
 0x1cc   : > { %v698_v34 = vadd.f32 %v686_v28, %v622_v4  ;;  %v699_v21 = vadd.f32 %v687_v25, %v623_v5  ;;  %v754_v60 = vsel %vm750_vm6, %v741_v29, %v743_v30 }
 0x1ce   : > { %v2203_v15 = vadd.f32 %v753_v36, %v698_v34  ;;  %v2205_v11 = vadd.f32 %v754_v60, %v699_v21 }
 0x1d2   : > { %v918_v31 = vpop.permute.xlu0 %917  ;;  %v745_v22 = vpop.permute.xlu2 %744 }
 0x1d3   : > { %v848_v37 = vpop.permute.xlu1 %847 }
 0x1d4   : > { %v858_v48 = vsel %vm683_vm5, %v846_v6, %v848_v37  ;;  %v875_v12 = vadd.f32 %v848_v37, %v803_v50 }
 0x1d5   : > { %v874_v52 = vadd.f32 %v858_v48, %v802_v51  ;;  %v806_v51 = vmul.f32 %v1913_v24, %v2043_v46 }
 0x1da   : > { %v682_v35 = vpop.permute.xlu0 %681  ;;  %v2207_v43 = vpop.permute.xlu2 %1060 }
 0x1db   : > { %v844_v2 = vpop.permute.xlu1 %843 }
 0x1dc   : > { %v857_v61 = vsel %vm683_vm5, %v844_v2, %v846_v6 }
 0x1dd   : > { %v873_v29 = vadd.f32 %v857_v61, %v801_v18 }
 0x1e2   : > { %v1065_v47 = vpop.permute.xlu0 %1064  ;;  %v2214_v0 = vpop.permute.xlu2 %1132 }
 0x1e3   : > { %v920_v14 = vpop.permute.xlu1 %919 }
 0x1e4   : > { %v930_v53 = vsel %vm750_vm6, %v918_v31, %v920_v14  ;;  %v947_v63 = vadd.f32 %v920_v14, %v875_v12  ;;  %v805_v12 = vmul.f32 %v1913_v24, %v1972_v57 }
 0x1e5   : > { %v946_v56 = vadd.f32 %v930_v53, %v874_v52 }
 0x1e6   : > { %970 = vrot.lane.b32.xlu1 %v947_v63, %s1684_s12 }
 0x1e7   : > { %968 = vrot.lane.b32.xlu0 %v946_v56, %s1684_s12  ;;  %v1017_v56 = vmul.f32 %v1899_v17, %v2043_v46 }
 0x1ea   : > { %v1137_v49 = vpop.permute.xlu0 %1136  ;;  %v680_v19 = vpop.permute.xlu2 %679 }
 0x1eb   : > { %v689_v59 = vsel %vm683_vm5, %v680_v19, %v682_v35  ;;  %v916_v36 = vpop.permute.xlu1 %915 }
 0x1ec   : > { %v701_v20 = vadd.f32 %v689_v59, %v625_v16  ;;  %v929_v44 = vsel %vm750_vm6, %v916_v36, %v918_v31  ;;  %v1016_v16 = vmul.f32 %v1899_v17, %v1972_v57  ;;  %v1089_v59 = vadd.f32 %v1065_v47, %v1017_v56 }
 0x1ed   : > { %v945_v58 = vadd.f32 %v929_v44, %v873_v29 }
 0x1ee   : > { %v1161_v44 = vadd.f32 %v1137_v49, %v1089_v59 }
 0x1ef   : > { %966 = vrot.lane.b32.xlu0 %v945_v58, %s1684_s12 }
 0x1f0   : > { %v1182_v57 = vmul.f32 %v1941_v42, %v1161_v44 }
 0x1f2   : > { %v747_v4 = vpop.permute.xlu0 %746  ;;  %v1063_v35 = vpop.permute.xlu2 %1062 }
 0x1f3   : > { %v755_v6 = vsel %vm750_vm6, %v745_v22, %v747_v4  ;;  %v1057_v5 = vpop.permute.xlu1 %1056  ;;  %v1071_v61 = vsel %vm683_vm5, %v1063_v35, %v1065_v47  ;;  %v1070_v47 = vsel %vm683_vm5, %v2207_v43, %v1063_v35 }
 0x1f4   : > { %v1068_v27 = vsel %vm683_vm5, %v2160_v39, %v1057_v5  ;;  %v1069_v26 = vsel %vm683_vm5, %v1057_v5, %v2162_v41  ;;  %v624_v39 = vmul.f32 %v2063_v8, %v1860_v33 }
 0x1f5   : > { %v2231_v38 = vadd.f32 %v1068_v27, %v1935_v40  ;;  %v1085_v28 = vadd.f32 %v1069_v26, %v1969_v54 }
 0x1fa   : > { %v852_v2 = vpop.permute.xlu0 %851  ;;  %v1135_v48 = vpop.permute.xlu2 %1134 }
 0x1fb   : > { %v1129_v25 = vpop.permute.xlu1 %1128  ;;  %v1143_v36 = vsel %vm750_vm6, %v1135_v48, %v1137_v49 }
 0x1fc   : > { %v1141_v30 = vsel %vm750_vm6, %v1129_v25, %v2182_v45 }
 0x1fd   : > { %v1157_v34 = vadd.f32 %v1141_v30, %v1085_v28  ;;  %v1015_v28 = vmul.f32 %v1899_v17, %v2063_v8 }
 0x1ff   : > { %v1178_v21 = vmul.f32 %v2191_v62, %v1157_v34 }
 0x201   : > { %1200 = vrot.lane.b32.xlu0 %v1178_v21, %s1685_s14  ;;  %v1087_v21 = vadd.f32 %v1070_v47, %v1015_v28 }
 0x202   : > { %v924_v14 = vpop.permute.xlu0 %923 }
 0x203   : > { %v678_v60 = vpop.permute.xlu1 %677 }
 0x204   : > { %v688_v40 = vsel %vm683_vm5, %v678_v60, %v680_v19 }
 0x205   : > { %v700_v31 = vadd.f32 %v688_v40, %v624_v39 }
 0x207   : > { %v2243_v22 = vadd.f32 %v755_v6, %v700_v31  ;;  %v1121_v6 = vpop.permute.xlu2 %1120 }
 0x208   : > { %v1138_v49 = vsel %vm750_vm6, %v1121_v6, %v2142_v13  ;;  %v1179_v13 = vmul.f32 %v1941_v42, %v2186_v10 }
 0x209   : > { %v1153_v43 = vadd.f32 %v1138_v49, %v2131_v1 }
 0x20a   : > { %v1127_v17 = vpop.permute.xlu0 %1126 }
 0x20b   : > { %v749_v41 = vpop.permute.xlu1 %748 }
 0x20c   : > { %v756_v54 = vsel %vm750_vm6, %v747_v4, %v749_v41  ;;  %v804_v4 = vmul.f32 %v1913_v24, %v2063_v8  ;;  %v1142_v24 = vsel %vm750_vm6, %v2214_v0, %v1135_v48  ;;  %v1174_v8 = vmul.f32 %v1911_v23, %v1153_v43 }
 0x20d   : > { %v2246_v37 = vadd.f32 %v756_v54, %v701_v20  ;;  %v1088_v20 = vadd.f32 %v1071_v61, %v1016_v16  ;;  %v1159_v39 = vadd.f32 %v1142_v24, %v1087_v21  ;;  %v1140_v0 = vsel %vm750_vm6, %v1127_v17, %v1129_v25 }
 0x20e   : > { %v1156_v60 = vadd.f32 %v1140_v0, %v2231_v38 }
 0x20f   : > { %v1160_v58 = vadd.f32 %v1143_v36, %v1088_v20  ;;  %v965_v40 = vpop.permute.xlu2 %964 }
 0x210   : > { %v1177_v1 = vmul.f32 %v1911_v23, %v1156_v60 }
 0x211   : > { %v1181_v34 = vmul.f32 %v2191_v62, %v1160_v58  ;;  %v1180_v62 = vmul.f32 %v1911_v23, %v1159_v39 }
 0x213   : > { %v854_v45 = vpop.permute.xlu1 %853 }
 0x214   : > { %v860_v33 = vsel %vm683_vm5, %v852_v2, %v854_v45  ;;  %v878_v52 = vadd.f32 %v854_v45, %v806_v51 }
 0x215   : > { %v877_v53 = vadd.f32 %v860_v33, %v805_v12  ;;  %v1246_v12 = vld [vmem:[%s2374_s6] sm:$0xf] }
 0x219   : > { %v961_v41 = vpop.permute.xlu2 %960 }
 0x21b   : > { %v850_v50 = vpop.permute.xlu1 %849 }
 0x21c   : > { %v859_v46 = vsel %vm683_vm5, %v850_v50, %v852_v2  ;;  %v575_v2 = vld [vmem:[%s2375_s7] ss:$2 sm:$0x3] }
 0x21d   : > { %v876_v5 = vadd.f32 %v859_v46, %v804_v4  ;;  %v771_v50 = vperm.slane %v575_v2, 1 }
 0x21f   : > { %v779_v23 = vmul.f32 %v771_v50, %v2246_v37 }
 0x221   : > { %v1197_v54 = vpop.permute.xlu2 %1196 }
 0x223   : > { %v926_v63 = vpop.permute.xlu1 %925 }
 0x224   : > { %v932_v18 = vsel %vm750_vm6, %v924_v14, %v926_v63  ;;  %v950_v19 = vadd.f32 %v926_v63, %v878_v52  ;;  %v775_v52 = vmul.f32 %v771_v50, %v2147_v9 }
 0x225   : > { %v949_v29 = vadd.f32 %v932_v18, %v877_v53  ;;  %v770_v53 = vperm.slane %v575_v2, 0 }
 0x226   : > { %976 = vrot.lane.b32.xlu2 %v950_v19, %s1684_s12  ;;  %v777_v19 = vmul.f32 %v771_v50, %v2205_v11  ;;  %v781_v16 = vadd.f32 %v775_v52, %v1879_v7 }
 0x227   : > { %974 = vrot.lane.b32.xlu1 %v949_v29, %s1684_s12  ;;  %v778_v29 = vmul.f32 %v770_v53, %v2243_v22  ;;  %v774_v36 = vmul.f32 %v770_v53, %v2134_v3 }
 0x228   : > { %v783_v6 = vadd.f32 %v777_v19, %v1866_v55 }
 0x229   : > { %v784_v11 = vadd.f32 %v778_v29, %v1858_v32  ;;  %v780_v22 = vadd.f32 %v774_v36, %v1879_v7 }
 0x22b   : > { %v922_v27 = vpop.permute.xlu1 %921 }
 0x22c   : > { %v931_v26 = vsel %vm750_vm6, %v922_v27, %v924_v14  ;;  %v785_v14 = vadd.f32 %v779_v23, %v1858_v32 }
 0x22d   : > { %v948_v30 = vadd.f32 %v931_v26, %v876_v5 }
 0x22e   : > { %1208 = vrot.lane.b32.xlu2 %v1182_v57, %s1685_s14 }
 0x22f   : > { %1206 = vrot.lane.b32.xlu1 %v1181_v34, %s1685_s14  ;;  %972 = vrot.lane.b32.xlu0 %v948_v30, %s1684_s12  ;;  %v776_v30 = vmul.f32 %v770_v53, %v2203_v15  ;;  %v1290_v53 = vld.sshfl [vmem:[#allocation1] sm:$0xff pattern:$0x75316420] }
 0x233   : > { %v963_v31 = vpop.permute.xlu1 %962 }
 0x234   : > { %v980_v37 = vsel %vm978_vm8, %v963_v31, %v965_v40  ;;  %v979_v49 = vsel %vm978_vm8, %v961_v41, %v963_v31 }
 0x235   : > { %v992_v20 = vadd.f32 %v980_v37, %v781_v16  ;;  %v991_v17 = vadd.f32 %v979_v49, %v780_v22 }
 0x236   : > { %1192 = vrot.lane.b32.xlu2 %v1174_v8, %s1685_s14 }
 0x237   : > { %1202 = vrot.lane.b32.xlu1 %v1179_v13, %s1685_s14  ;;  %1204 = vrot.lane.b32.xlu0 %v1180_v62, %s1685_s14  ;;  %v782_v62 = vadd.f32 %v776_v30, %v1866_v55  ;;  %v1241_v55 = vld [vmem:[%s2373_s5] sm:$0x3] }
 0x23b   : > { %v1195_v10 = vpop.permute.xlu1 %1194 }
 0x23c   : > { %v1212_v9 = vsel %vm1210_vm9, %v1195_v10, %v1197_v54 }
 0x23d   : > { %v1224_v4 = vadd.f32 %v1212_v9, %v992_v20 }
 0x23f   : > { %1198 = vrot.lane.b32.xlu0 %v1177_v1, %s1685_s14  ;;  %1249 = vperm.xlu1 %1588, %v1246_v12   ;;  %v1230_v32 = vmax.f32 %v1224_v4, 0.0  ;;  %v1291_v12 = vld.sshfl [vmem:[#allocation1 + $0x8] sm:$0xff pattern:$0x75316420]  ;;  %s1314_s14 = scalar_lea.hbm %s2376_s8, %s1492_s26 }
 0x240   : > { %s1318_s20 = sshll.u32 %s1314_s14, 4  ;;  %s1319_s20 = int_to_ptr.hbm [resolvable:$true] %s1318_s20 }
 0x241   : > { %v1236_v60 = vmin.f32 %v1230_v32, 6.0  ;;  %s1604_s21 = sshra.s32 %s1319_s20, 4  ;;  %s1605_s21 = int_to_ptr.hbm [resolvable:$true] %s1604_s21 }
 0x242   : > { %s1606_s22 = scalar_lea.hbm %s1605_s21, 8  ;;  %p1611_p1 = scmp.lt.s32.totalorder %s1605_s21, %s2376_s8 }
 0x243   : > { %p1607_p12 = scmp.ne.s32.totalorder %s1605_s21, %s1606_s22  ;;  %p1612_p2 = scmp.lt.s32.totalorder %s1610_s25, %s1606_s22 }
 0x245   : > { %p1608_p13 = pnand %p1607_p12, %p1771_p4  ;;  %p1613_p3 = por %p1612_p2, %p1611_p1 }
 0x247   : > { %p1609_p0 = pneg %p1608_p13 }
 0x249   : > { %p1614_p5 = pnand %p1613_p3, %p1609_p0 }
 0x258   : > { %v971_v45 = vpop.permute.xlu1 %970 }
 0x259   : > { %v969_v42 = vpop.permute.xlu0 %968 }
 0x25a   : > { %v982_v46 = vsel %vm978_vm8, %v969_v42, %v971_v45 }
 0x25b   : > { %v994_v57 = vadd.f32 %v982_v46, %v783_v6 }
 0x261   : > { %v967_v25 = vpop.permute.xlu0 %966 }
 0x262   : > { %v981_v15 = vsel %vm978_vm8, %v967_v25, %v969_v42 }
 0x263   : > { %v993_v31 = vadd.f32 %v981_v15, %v782_v62 }
 0x273   : > { %v2294_v48 = vpop.permute.xlu0 %1200 }
 0x280   : > { %v977_v35 = vpop.permute.xlu2 %976 }
 0x288   : > { %v1209_v51 = vpop.permute.xlu2 %1208 }
 0x290   : > { %v1193_v27 = vpop.permute.xlu2 %1192 }
 0x291   : > { %v1211_v7 = vsel %vm1210_vm9, %v1193_v27, %v1195_v10 }
 0x292   : > { %v1223_v0 = vadd.f32 %v1211_v7, %v991_v17 }
 0x294   : > { %v1229_v10 = vmax.f32 %v1223_v0, 0.0 }
 0x296   : > { %v1235_v25 = vmin.f32 %v1229_v10, 6.0 }
 0x299   : > { %v975_v38 = vpop.permute.xlu1 %974 }
 0x29a   : > { %v984_v33 = vsel %vm978_vm8, %v975_v38, %v977_v35 }
 0x29b   : > { %v996_v63 = vadd.f32 %v984_v33, %v785_v14 }
 0x2a1   : > { %v973_v56 = vpop.permute.xlu0 %972  ;;  %v1207_v61 = vpop.permute.xlu1 %1206 }
 0x2a2   : > { %v1216_v18 = vsel %vm1210_vm9, %v1207_v61, %v1209_v51  ;;  %v983_v58 = vsel %vm978_vm8, %v973_v56, %v975_v38 }
 0x2a3   : > { %v1228_v59 = vadd.f32 %v1216_v18, %v996_v63  ;;  %v995_v47 = vadd.f32 %v983_v58, %v784_v11 }
 0x2a5   : > { %v1234_v44 = vmax.f32 %v1228_v59, 0.0 }
 0x2a7   : > { %v1240_v5 = vmin.f32 %v1234_v44, 6.0 }
 0x2a9   : > { %v1205_v26 = vpop.permute.xlu0 %1204  ;;  %v1203_v3 = vpop.permute.xlu1 %1202  ;;  %v1245_v28 = vpack.c.bf16 %v1240_v5, %v1240_v5 }
 0x2aa   : > { %v1215_v34 = vsel %vm1210_vm9, %v1205_v26, %v1207_v61  ;;  %v1214_v24 = vsel %vm1210_vm9, %v2294_v48, %v1203_v3 }
 0x2ab   : > { %v1227_v21 = vadd.f32 %v1215_v34, %v995_v47  ;;  %v1226_v43 = vadd.f32 %v1214_v24, %v994_v57  ;;  %v1261_v39 = vsel %vm1256_vm10, %v1245_v28, 0 }
 0x2ac   : > { %1282 = vmatpush.bf16.msra.mxu3 %v1261_v39 }
 0x2ad   : > { %v1232_v8 = vmax.f32 %v1226_v43, 0.0  ;;  %v1233_v13 = vmax.f32 %v1227_v21, 0.0 }
 0x2af   : > { %v1238_v1 = vmin.f32 %v1232_v8, 6.0  ;;  %v1239_v40 = vmin.f32 %v1233_v13, 6.0 }
 0x2b1   : > { %v1199_v41 = vpop.permute.xlu0 %1198  ;;  %v1243_v54 = vpack.c.bf16 %v1238_v1, %v1236_v60  ;;  %v1244_v45 = vpack.c.bf16 %v1239_v40, %v1239_v40 }
 0x2b2   : > { %v1213_v35 = vsel %vm1210_vm9, %v1199_v41, %v2294_v48  ;;  %v1250_v48 = vpop.permute.xlu1 %1249 }
 0x2b3   : > { %v1225_v2 = vadd.f32 %v1213_v35, %v993_v31  ;;  %1283 = vmatpush.bf16.msra.mxu3 %v1243_v54  ;;  %v1258_v50 = vsel %vm1256_vm10, %v1244_v45, 0 }
 0x2b4   : > { %1269 = vmatpush.bf16.msra.mxu2 %v1258_v50 }
 0x2b5   : > { %v1231_v42 = vmax.f32 %v1225_v2, 0.0 }
 0x2b6   : > { %1484 = vmatmul.msk.bf16.vlgmr.msra.gmra.mxu3 %vm1252_vm11, %v1241_v55 }
 0x2b7   : > { %v1237_v38 = vmin.f32 %v1231_v42, 6.0 }
 0x2b9   : > { %v1242_v23 = vpack.c.bf16 %v1237_v38, %v1235_v25 }
 0x2bb   : > { %1270 = vmatpush.bf16.msra.mxu2 %v1242_v23 }
 0x2be   : > { %1483 = vmatmul.msk.bf16.vlgmr.msra.gmra.mxu2 %vm1252_vm11, %v1241_v55 }
 0x339   : > { %v1285_v51 = vpop.f32.mrf.mxu3 }
 0x33a   : > { %v1286_v33 = vadd.f32 %v1285_v51, %v1250_v48 }
 0x33c   : > { %v1295_v52 = vadd.f32 %v1291_v12, %v1286_v33 }
 0x33e   : > { %v1298_v56 = vrot.slane %v1295_v52, 4 }
 0x341   : > { %v1272_v14 = vpop.f32.mrf.mxu2  ;;  %v1287_v63 = vpop.f32.mrf.mxu3 }
 0x342   : > { %v1273_v61 = vadd.f32 %v1272_v14, %v1250_v48 }
 0x344   : > { %v1294_v37 = vadd.f32 %v1290_v53, %v1273_v61 }
 0x346   : > { %v1299_v18 = vsel %vm1256_vm10, %v1294_v37, %v1298_v56 }
 0x347   : > { %1301 = vst [vmem:[%s387_s16] sm:$0xff] %v1299_v18 }
 0x348   : > { %1617 = shalt.err (!%p1614_p5)
}
 0x349   : > { %1493 = dma.vmem_to_hbm [thread:$0]  (%p1771_p4), %s1317_s19, 128, %s1319_s20, %s1303_s30   ;;  %v1274_v19 = vpop.f32.mrf.mxu2 }
 0x34a PF: > { %p1499_p6 = scmp.ge.s32.totalorder %s1668_s10, 2  ;;  %s1330_s24 = sand.u32 1, %s1648_s27  }
 0x34b   : > { %s1331_s14 = scalar_lea.sflag [#allocation4], %s1330_s24 }
 0x34c   : > { %p1496_p7 = pnand %p1499_p6, %p1778_p8 }
 0x34e   : > { %p1497_p9 = pneg %p1496_p7 }
 0x350   : > { %1643 = dma.done.wait (%p1497_p9), %s1331_s14, 128  }
 0x351   : > { %1645 = vsyncadd (%p1497_p9), %s1331_s14, 4294967168  ;;  %s21_s10 = sadd.s32 1, %s1668_s10   ;;  %s2379_s27 = smov %s1652_s28 }
 0x352   : > { %p18_p10 = scmp.ge.s32.totalorder %s21_s10, 4   ;;  %s2380_s28 = smov %s1656_s29 }
 0x353   : > { %s2381_s29 = smov %s1784_s18  ;;  %s2382_s30 = smov %s1664_s9 }
 0x354   : > { %s2383_s9 = smov %s2385_s13  ;;  %20 = sbr.rel (!%p18_p10) target bundleno = 4 (0x4), region = 107 }
 0x359   :  { %1337 = vsyncpa [#allocation4], 1 }
 0x35a   :  { %1339 = vsyncpa [#allocation4 + $0x1], 1 }

</bundles_post_ra>
